<compile_context>
chip_gen: v7x
topology: tpu7x:2x2x1
jax: 0.10.0
libtpu: 0.0.40
codegen_flags: <defaults>
</compile_context>

<pallas_src>
import functools

import jax
import jax.numpy as jnp
from jax.experimental import pallas as pl
from jax.experimental.pallas import tpu as pltpu

T_TOTAL = 2 ** 5 - 1   # 31
TIME_STEP = T_TOTAL    # 31

_MIB = 1 << 20


def _ceil_div(a, b):
    return -(-a // b)


def _pad_to(a, b):
    return _ceil_div(a, b) * b


def _tpu_topology():
    """(tensorcores_per_chip, vmem_capacity_bytes), queried defensively.

    Falls back to (1 core, 64 MiB) — i.e. v5e/v6e behaviour (no head split) and a
    v7x-sized VMEM budget — if the introspection API does not expose the fields.
    """
    cores, vmem = 1, 64 * _MIB
    try:
        info = pltpu.get_tpu_info()
        for name in ("vmem_capacity_bytes", "vmem_bytes", "vmem_size_bytes"):
            v = getattr(info, name, None)
            if v:
                vmem = int(v)
                break
        for name in ("num_cores", "tensorcore_count", "num_tensorcores", "core_count"):
            v = getattr(info, name, None)
            if v:
                cores = int(v)
                break
    except Exception:
        pass
    return cores, vmem


def _choose_heads_per_program(BH, n_chunks, min_programs, block_bytes_fn, budget,
                              need_mult8):
    """Largest divisor `gh` of BH whose block fits `budget`, preferring choices that
    yield at least `min_programs` grid programs (multi-TC chips only get >1 because
    `min_programs` is derived from the detected core count).  Returns (gh, fits)."""
    cands = [d for d in range(BH, 0, -1)
             if BH % d == 0 and (not need_mult8 or d == BH or d % 8 == 0)]
    fits = [d for d in cands if block_bytes_fn(d) <= budget]
    if not fits:
        return cands[-1], False
    enough = [d for d in fits if n_chunks * (BH // d) >= min_programs]
    return (enough[0] if enough else fits[0]), True


# --------------------------- Pass 1: time reduction ---------------------------


def _time_sum_blocked_kernel(x_ref, y_ref, xs_ref, ys_ref):
    # x_ref: (step, gh, S*D), y_ref: (step, gh, D*S) — lane-dense minor dims.
    # Unscaled f32 sums (the 1/step^2 scale is applied once in the matmul pass).
    xs_ref[...] = jnp.sum(x_ref[...].astype(jnp.float32), axis=0)
    ys_ref[...] = jnp.sum(y_ref[...].astype(jnp.float32), axis=0)


def _time_sum_acc_kernel(x_ref, y_ref, xs_ref, ys_ref):
    # `step` is the innermost "arbitrary" grid axis; accumulate into the resident
    # output block (31x smaller VMEM blocks, 31 small overlapped DMAs per chunk).
    @pl.when(pl.program_id(2) == 0)
    def _():
        xs_ref[...] = jnp.zeros_like(xs_ref)
        ys_ref[...] = jnp.zeros_like(ys_ref)

    xs_ref[...] += x_ref[...].astype(xs_ref.dtype)
    ys_ref[...] += y_ref[...].astype(ys_ref.dtype)


# --------------------------- Pass 2: per-chunk matmul -------------------------


def _weight_matmul_kernel(xs_ref, ys_ref, w_ref, *, inv_step_sq, mm_dtype):
    # xs_ref: (gh, S, D), ys_ref: (gh, D, S), w_ref: (gh, S, S).
    # Traffic here is ~1/(2*step) of pass 1, so layout is not on the critical path;
    # the (gh, S, S) store is kept unflattened to avoid an in-kernel relayout.
    w = jnp.einsum(
        "gsd,gdt->gst",
        xs_ref[...].astype(mm_dtype),
        ys_ref[...].astype(mm_dtype),
        preferred_element_type=jnp.float32,
    )
    w_ref[...] = (w * jnp.float32(inv_step_sq)).astype(w_ref.dtype)


# ----------------------------------- Wrapper ----------------------------------


def spike_inner_product(x, y, T=T_TOTAL, step=TIME_STEP, *,
                        materialize_time=True, time_as_grid_axis=None):
    """x: (Tx, B, H, S, D), y: (Tx, B, H, D, S) -> (Tx, B, H, S, S) float32.

    materialize_time=False returns the de-duplicated per-chunk weights
    (n_chunks, B, H, S, S) so a fused consumer can skip the time broadcast.
    time_as_grid_axis: None = auto (VMEM-budget based), True/False = force variant.
    """
    Tx, B, H, S, D = x.shape
    assert y.shape == (Tx, B, H, D, S)
    assert Tx >= T, "x must provide at least T timesteps"
    assert T % step == 0, "PyTorch version would index OOB otherwise"

    BH = B * H
    L = S * D
    n_chunks = T // step
    in_dtype = x.dtype
    in_item = x.dtype.itemsize

    num_cores, vmem_cap = _tpu_topology()
    min_programs = max(1, num_cores)                       # only >1 on multi-TC chips
    budget = max(8 * _MIB, min(28 * _MIB, vmem_cap // 2 - 8 * _MIB))

    # ---- Pass 1: lane-dense time reduction (the HBM-bound bulk of the work) ----
    # Free, contiguous reshapes: minor dim becomes S*D / D*S instead of 16-wide D /
    # 8-wide S, so vregs and VMEM tiles are fully populated.
    x2 = x.reshape(Tx, BH, L)
    y2 = y.reshape(Tx, BH, L)
    lanes = _pad_to(L, 128)

    def _blocked_bytes(gh):   # 2 inputs (step, gh, L) + 2 outputs (gh, L), double-buffered
        per = _pad_to(gh, 8) * lanes
        return 2 * 2 * per * (step * in_item + 4)

    def _acc_bytes(gh):       # per-timestep (gh, L) blocks on inputs and outputs
        per = _pad_to(gh, 8) * lanes
        return 2 * 2 * per * (in_item + 4)

    gh_a, fits = _choose_heads_per_program(
        BH, n_chunks, min_programs, _blocked_bytes, budget, need_mult8=True)
    use_time_grid = (not fits) if time_as_grid_axis is None else bool(time_as_grid_axis)
    if use_time_grid:
        gh_a, _ = _choose_heads_per_program(
            BH, n_chunks, min_programs, _acc_bytes, budget, need_mult8=True)
        a_bytes = _acc_bytes(gh_a)
    else:
        a_bytes = _blocked_bytes(gh_a)
    n_groups_a = BH // gh_a

    if use_time_grid:
        grid_a = (n_chunks, n_groups_a, step)
        in_specs_a = [
            pl.BlockSpec((pl.Squeezed(), gh_a, L),
                         lambda c, g, t: (c * step + t, g, 0)),
            pl.BlockSpec((pl.Squeezed(), gh_a, L),
                         lambda c, g, t: (c * step + t, g, 0)),
        ]
        out_specs_a = (
            pl.BlockSpec((pl.Squeezed(), gh_a, L), lambda c, g, t: (c, g, 0)),
            pl.BlockSpec((pl.Squeezed(), gh_a, L), lambda c, g, t: (c, g, 0)),
        )
        kernel_a = _time_sum_acc_kernel
        dims_a = ("parallel", "parallel", "arbitrary")
    else:
        grid_a = (n_chunks, n_groups_a)
        in_specs_a = [
            pl.BlockSpec((step, gh_a, L), lambda c, g: (c, g, 0)),
            pl.BlockSpec((step, gh_a, L), lambda c, g: (c, g, 0)),
        ]
        out_specs_a = (
            pl.BlockSpec((pl.Squeezed(), gh_a, L), lambda c, g: (c, g, 0)),
            pl.BlockSpec((pl.Squeezed(), gh_a, L), lambda c, g: (c, g, 0)),
        )
        kernel_a = _time_sum_blocked_kernel
        dims_a = ("parallel", "parallel")

    vmem_limit_a = int(min(vmem_cap - 2 * _MIB, max(32 * _MIB, a_bytes + 8 * _MIB)))

    xs_flat, ys_flat = pl.pallas_call(
        kernel_a,
        out_shape=(jax.ShapeDtypeStruct((n_chunks, BH, L), jnp.float32),
                   jax.ShapeDtypeStruct((n_chunks, BH, L), jnp.float32)),
        grid=grid_a,
        in_specs=in_specs_a,
        out_specs=out_specs_a,
        compiler_params=pltpu.CompilerParams(
            dimension_semantics=dims_a,
            vmem_limit_bytes=vmem_limit_a,
        ),
    )(x2, y2)

    # ---- Pass 2: tiny batched (S, D) @ (D, S) on the de-duplicated sums ----------
    # Un-flattening happens here in the wrapper (free XLA reshape of a tiny tensor),
    # not inside a kernel.
    xs = xs_flat.reshape(n_chunks, BH, S, D)
    ys = ys_flat.reshape(n_chunks, BH, D, S)

    def _mm_bytes(gh):
        tiles = (_pad_to(S, 8) * _pad_to(D, 128) + _pad_to(D, 8) * _pad_to(S, 128)
                 + _pad_to(S, 8) * _pad_to(S, 128))
        return 2 * gh * tiles * 4

    gh_b, _ = _choose_heads_per_program(
        BH, n_chunks, min_programs, _mm_bytes, budget, need_mult8=False)
    n_groups_b = BH // gh_b

    # f32 inputs keep an f32 matmul (exactness vs the PyTorch reference); anything
    # narrower (spike-style bf16) uses the native bf16 MXU path with f32 accumulate.
    mm_dtype = jnp.float32 if in_dtype == jnp.float32 else jnp.bfloat16
    kernel_b = functools.partial(
        _weight_matmul_kernel,
        inv_step_sq=1.0 / float(step * step),
        mm_dtype=mm_dtype,
    )

    w = pl.pallas_call(
        kernel_b,
        out_shape=jax.ShapeDtypeStruct((n_chunks, BH, S, S), jnp.float32),
        grid=(n_chunks, n_groups_b),
        in_specs=[
            pl.BlockSpec((pl.Squeezed(), gh_b, S, D), lambda c, g: (c, g, 0, 0)),
            pl.BlockSpec((pl.Squeezed(), gh_b, D, S), lambda c, g: (c, g, 0, 0)),
        ],
        out_specs=pl.BlockSpec((pl.Squeezed(), gh_b, S, S), lambda c, g: (c, g, 0, 0)),
        compiler_params=pltpu.CompilerParams(
            dimension_semantics=("parallel", "parallel"),
        ),
    )(xs, ys)

    w = w.reshape(n_chunks, B, H, S, S)
    if not materialize_time:
        return w

    # Cheap, lane-dense XLA broadcast of each chunk weight over its `step`
    # timesteps; the Tx>T tail is zero-filled with a pad (no full-output copy).
    out = jnp.broadcast_to(w[:, None], (n_chunks, step, B, H, S, S))
    out = out.reshape(T, B, H, S, S)
    if Tx > T:
        out = jnp.pad(out, ((0, Tx - T), (0, 0), (0, 0), (0, 0), (0, 0)))
    return out


# --------------------------------- Reference -----------------------------------


def _reference(x, y, T=T_TOTAL, step=TIME_STEP):
    """Pure-JAX replica of the PyTorch forward (for verification)."""
    Tx, B, H, S, D = x.shape
    out = jnp.zeros((Tx, B, H, S, y.shape[-1]), jnp.float32)
    for i in range(0, T, step):
        x_add = sum(x[i + j].astype(jnp.float32) / step for j in range(step))
        y_add = sum(y[i + j].astype(jnp.float32) / step for j in range(step))
        w = jnp.einsum("bhsd,bhdt->bhst", x_add, y_add)
        for j in range(step):
            out = out.at[i + j].set(w)
    return out


if __name__ == "__main__":
    key = jax.random.PRNGKey(0)
    kx, ky = jax.random.split(key)

    # Small shapes consistent with the module: T=31 (module default), B=2,
    # n_heads=2, S=8, head_dim=16 (S*D = 128 -> exactly lane-dense reduction rows).
    T, B, H, S, D = T_TOTAL, 2, 2, 8, 16
    x = jax.random.normal(kx, (T, B, H, S, D), dtype=jnp.float32)
    y = jax.random.normal(ky, (T, B, H, D, S), dtype=jnp.float32)

    ref = _reference(x, y, T=T, step=TIME_STEP)

    # Default path: whole 31-step chunk per grid program (fits the VMEM budget here).
    out = jax.block_until_ready(spike_inner_product(x, y, T=T, step=TIME_STEP))
    assert out.shape == (T, B, H, S, S)
    assert jnp.allclose(out, ref, atol=5e-3, rtol=5e-3), "mismatch (blocked path)"

    # Large-shape path: step as an innermost "arbitrary" accumulator grid axis.
    # Auto-selected when blocks would not fit VMEM; forced here for coverage.
    out_acc = jax.block_until_ready(
        spike_inner_product(x, y, T=T, step=TIME_STEP, time_as_grid_axis=True))
    assert jnp.allclose(out_acc, ref, atol=5e-3, rtol=5e-3), "mismatch (acc path)"

    # bf16 spike-style inputs: half the HBM read bytes, bf16 MXU matmul.
    out_bf16 = jax.block_until_ready(
        spike_inner_product(x.astype(jnp.bfloat16), y.astype(jnp.bfloat16),
                            T=T, step=TIME_STEP))
    assert jnp.allclose(out_bf16, ref, atol=5e-2, rtol=5e-2), "mismatch (bf16 path)"

    print("KERNEL_OK")
</pallas_src>

<mosaic_0001>
module attributes {stable_mosaic.version = 11 : i64} {
  func.func @_time_sum_blocked_kernel(%arg0: i32, %arg1: i32, %arg2: memref<31x4x128xf32, #tpu.memory_space<vmem>>, %arg3: memref<31x4x128xf32, #tpu.memory_space<vmem>>, %arg4: memref<1x4x128xf32, #tpu.memory_space<vmem>>, %arg5: memref<1x4x128xf32, #tpu.memory_space<vmem>>) attributes {dimension_semantics = [#tpu.dimension_semantics<parallel>, #tpu.dimension_semantics<parallel>], iteration_bounds = array<i64: 1, 1>, scalar_prefetch = 0 : i64, scratch_operands = 0 : i64, tpu.core_type = #tpu.core_type<tc>, window_params = [{transform_indices = @transform_0, window_bounds = array<i64: 31, 4, 128>}, {transform_indices = @transform_1, window_bounds = array<i64: 31, 4, 128>}, {transform_indices = @transform_2, window_bounds = array<i64: 1, 4, 128>}, {transform_indices = @transform_3, window_bounds = array<i64: 1, 4, 128>}]} {
    %c0 = arith.constant 0 : index
    %c0_0 = arith.constant 0 : index
    %c0_1 = arith.constant 0 : index
    %0 = vector.load %arg2[%c0, %c0_0, %c0_1] : memref<31x4x128xf32, #tpu.memory_space<vmem>>, vector<31x4x128xf32>
    %cst = arith.constant dense<0.000000e+00> : vector<4x128xf32>
    %1 = vector.multi_reduction <add>, %0, %cst [0] : vector<31x4x128xf32> to vector<4x128xf32>
    %c0_2 = arith.constant 0 : index
    %c0_3 = arith.constant 0 : index
    %c0_4 = arith.constant 0 : index
    %2 = vector.load %arg4[%c0_2, %c0_3, %c0_4] : memref<1x4x128xf32, #tpu.memory_space<vmem>>, vector<1x4x128xf32>
    %3 = vector.shape_cast %2 : vector<1x4x128xf32> to vector<4x128xf32>
    %4 = vector.shape_cast %1 : vector<4x128xf32> to vector<1x4x128xf32>
    tpu.vector_store %arg4[%c0_2, %c0_3, %c0_4], %4 {strides = array<i32>} : memref<1x4x128xf32, #tpu.memory_space<vmem>>, vector<1x4x128xf32>,
    %c0_5 = arith.constant 0 : index
    %c0_6 = arith.constant 0 : index
    %c0_7 = arith.constant 0 : index
    %5 = vector.load %arg3[%c0_5, %c0_6, %c0_7] : memref<31x4x128xf32, #tpu.memory_space<vmem>>, vector<31x4x128xf32>
    %cst_8 = arith.constant dense<0.000000e+00> : vector<4x128xf32>
    %6 = vector.multi_reduction <add>, %5, %cst_8 [0] : vector<31x4x128xf32> to vector<4x128xf32>
    %c0_9 = arith.constant 0 : index
    %c0_10 = arith.constant 0 : index
    %c0_11 = arith.constant 0 : index
    %7 = vector.load %arg5[%c0_9, %c0_10, %c0_11] : memref<1x4x128xf32, #tpu.memory_space<vmem>>, vector<1x4x128xf32>
    %8 = vector.shape_cast %7 : vector<1x4x128xf32> to vector<4x128xf32>
    %9 = vector.shape_cast %6 : vector<4x128xf32> to vector<1x4x128xf32>
    tpu.vector_store %arg5[%c0_9, %c0_10, %c0_11], %9 {strides = array<i32>} : memref<1x4x128xf32, #tpu.memory_space<vmem>>, vector<1x4x128xf32>,
    return
  }
  func.func @transform_0(%arg0: i32, %arg1: i32) -> (i32, i32, i32) {
    %c0_i32 = arith.constant 0 : i32
    %c0_i32_0 = arith.constant 0 : i32
    return %arg0, %arg1, %c0_i32 : i32, i32, i32
  }
  func.func @transform_1(%arg0: i32, %arg1: i32) -> (i32, i32, i32) {
    %c0_i32 = arith.constant 0 : i32
    %c0_i32_0 = arith.constant 0 : i32
    return %arg0, %arg1, %c0_i32 : i32, i32, i32
  }
  func.func @transform_2(%arg0: i32, %arg1: i32) -> (i32, i32, i32) {
    %c0_i32 = arith.constant 0 : i32
    %c0_i32_0 = arith.constant 0 : i32
    return %arg0, %arg1, %c0_i32 : i32, i32, i32
  }
  func.func @transform_3(%arg0: i32, %arg1: i32) -> (i32, i32, i32) {
    %c0_i32 = arith.constant 0 : i32
    %c0_i32_0 = arith.constant 0 : i32
    return %arg0, %arg1, %c0_i32 : i32, i32, i32
  }
}

</mosaic_0001>

<bundles_post_ra>
// kernel: tpu_custom_call.1
= control target key start
LH: loop header
LB: loop body
LE: loop exit
PB: predicated region body
PF: predicated region fallthrough
CT: control target
= control target key end

     0   :  { %9 = vsyncpa [#allocation3], 0  ;;  %s498_s0 = inlined_call_operand.hbm [shape: f32[31,4,128], index: 0, kind: input, shape index: {}]   ;;  %s499_s1 = inlined_call_operand.hbm [shape: f32[31,4,128], index: 1, kind: input, shape index: {}]   ;;  %s500_s2 = inlined_call_operand.hbm [shape: f32[1,4,128], index: 2, kind: output, shape index: {0}]   ;;  %s501_s3 = inlined_call_operand.hbm [shape: f32[1,4,128], index: 3, kind: output, shape index: {1}]  }
   0x1   :  { %10 = vsyncpa [#allocation6], 0 }
   0x2   :  { %11 = vsyncpa [#allocation4], 0 }
   0x3   :  { %12 = vsyncpa [#allocation9], 0  ;;  %s362_s12 = smov [#allocation2]   ;;  %s266_s16 = scalar_lea.hbm %s498_s0, 1984 }
   0x4   :  { %s18_s13 = sshll.u32 %s362_s12, 4  ;;  %p267_p0 = scmp.ne.s32.totalorder %s498_s0, %s266_s16  ;;  %s19_s13 = int_to_ptr.vmem [resolvable:$true] %s18_s13 }
   0x5   :  { %p270_p1 = scmp.lt.u32.totalorder %s266_s16, %s498_s0 }
   0x7   :  { %p272_p2 = pnand %p270_p1, %p267_p0 }
   0x9   :  { %275 = shalt.err (!%p272_p2)
}
   0xa   :  { %s276_s21 = scalar_lea.vmem %s19_s13, 1984  ;;  %p281_p4 = scmp.lt.s32.totalorder %s19_s13, %s19_s13 }
   0xb   :  { %p277_p3 = scmp.ne.s32.totalorder %s19_s13, %s276_s21  ;;  %p282_p5 = scmp.lt.s32.totalorder %s276_s21, %s276_s21 }
   0xd   :  { %p283_p6 = por %p282_p5, %p281_p4 }
   0xf   :  { %p284_p7 = pnand %p283_p6, %p277_p3 }
  0x11   :  { %287 = shalt.err (!%p284_p7)
}
  0x12   :  { %s363_s22 = smov 64   ;;  %s364_s23 = smov 4  }
  0x13   :  { %24 = dma.hbm_to_vmem [thread:$0]  %s498_s0, 1984, %s19_s13, [#allocation3], %s363_s22, %s363_s22, %s364_s23  }
  0x14   :  { %s365_s26 = smov [#allocation5]   ;;  %s288_s30 = scalar_lea.hbm %s499_s1, 1984 }
  0x15   :  { %s30_s27 = sshll.u32 %s365_s26, 4  ;;  %p289_p8 = scmp.ne.s32.totalorder %s499_s1, %s288_s30  ;;  %s31_s27 = int_to_ptr.vmem [resolvable:$true] %s30_s27 }
  0x16   :  { %p292_p9 = scmp.lt.u32.totalorder %s288_s30, %s499_s1 }
  0x18   :  { %p294_p10 = pnand %p292_p9, %p289_p8 }
  0x1a   :  { %297 = shalt.err (!%p294_p10)
}
  0x1b   :  { %s298_s8 = scalar_lea.vmem %s31_s27, 1984  ;;  %p303_p12 = scmp.lt.s32.totalorder %s31_s27, %s31_s27 }
  0x1c   :  { %p299_p11 = scmp.ne.s32.totalorder %s31_s27, %s298_s8  ;;  %p304_p13 = scmp.lt.s32.totalorder %s298_s8, %s298_s8 }
  0x1e   :  { %p305_p0 = por %p304_p13, %p303_p12 }
  0x20   :  { %p306_p1 = pnand %p305_p0, %p299_p11 }
  0x22   :  { %309 = shalt.err (!%p306_p1)
}
  0x23   :  { %36 = dma.hbm_to_vmem [thread:$0]  %s499_s1, 1984, %s31_s27, [#allocation6], %s363_s22, %s363_s22, %s364_s23  }
  0x24   :  { %354 = dma.done.wait [#allocation3], 1984  }
  0x25   :  { %355 = vsyncadd [#allocation3], 4294965312 }
  0x26   :  { %356 = dma.done.wait [#allocation6], 1984  }
  0x27   :  { %357 = vsyncadd [#allocation6], 4294965312  ;;  %vm74_vm0 = vcmask 1043456   ;;  %v43_v0 = vld [vmem:[#allocation2] sm:$0xf]  ;;  %s366_s1 = smov [#allocation7]  }
  0x28   :  { %v44_v1 = vld [vmem:[#allocation2 + $0x4] sm:$0xf]  ;;  %v45_v2 = vld [vmem:[#allocation2 + $0x8] sm:$0xf]  ;;  %v46_v3 = vld [vmem:[#allocation2 + $0xc] sm:$0xf] }
  0x29   :  { %v75_v4 = vsel %vm74_vm0, %v43_v0, 0.0  ;;  %v76_v5 = vsel %vm74_vm0, %v44_v1, 0.0  ;;  %v78_v6 = vsel %vm74_vm0, %v45_v2, 0.0  ;;  %v47_v7 = vld [vmem:[#allocation2 + $0x10] sm:$0xf]  ;;  %v80_v9 = vsel %vm74_vm0, %v46_v3, 0.0 }
  0x2a   :  { %v77_v8 = vadd.f32 %v76_v5, %v75_v4  ;;  %v48_v10 = vld [vmem:[#allocation2 + $0x14] sm:$0xf]  ;;  %v82_v12 = vsel %vm74_vm0, %v47_v7, 0.0  ;;  %v49_v13 = vld [vmem:[#allocation2 + $0x18] sm:$0xf]  ;;  %s236_s10 = sshll.u32 %s366_s1, 4  ;;  %s237_s10 = int_to_ptr.vmem [resolvable:$true] %s236_s10 }
  0x2b   :  { %v84_v15 = vsel %vm74_vm0, %v48_v10, 0.0  ;;  %v50_v16 = vld [vmem:[#allocation2 + $0x1c] sm:$0xf]  ;;  %v86_v18 = vsel %vm74_vm0, %v49_v13, 0.0  ;;  %v51_v19 = vld [vmem:[#allocation2 + $0x20] sm:$0xf]  ;;  %p315_p3 = scmp.lt.s32.totalorder %s237_s10, %s237_s10 }
  0x2c   :  { %v79_v11 = vadd.f32 %v78_v6, %v77_v8  ;;  %v88_v21 = vsel %vm74_vm0, %v50_v16, 0.0  ;;  %v52_v22 = vld [vmem:[#allocation2 + $0x24] sm:$0xf]  ;;  %v137_v24 = vld [vmem:[#allocation5] sm:$0xf]  ;;  %v90_v25 = vsel %vm74_vm0, %v51_v19, 0.0 }
  0x2d   :  { %v53_v26 = vld [vmem:[#allocation2 + $0x28] sm:$0xf]  ;;  %v138_v28 = vld [vmem:[#allocation5 + $0x4] sm:$0xf]  ;;  %v139_v29 = vld [vmem:[#allocation5 + $0x8] sm:$0xf] }
  0x2e   :  { %v81_v14 = vadd.f32 %v80_v9, %v79_v11  ;;  %v92_v30 = vsel %vm74_vm0, %v52_v22, 0.0  ;;  %v168_v31 = vsel %vm74_vm0, %v137_v24, 0.0  ;;  %v54_v32 = vld [vmem:[#allocation2 + $0x2c] sm:$0xf]  ;;  %v140_v34 = vld [vmem:[#allocation5 + $0xc] sm:$0xf] }
  0x2f   :  { %v94_v35 = vsel %vm74_vm0, %v53_v26, 0.0  ;;  %v169_v36 = vsel %vm74_vm0, %v138_v28, 0.0  ;;  %v171_v37 = vsel %vm74_vm0, %v139_v29, 0.0  ;;  %v55_v38 = vld [vmem:[#allocation2 + $0x30] sm:$0xf]  ;;  %v96_v42 = vsel %vm74_vm0, %v54_v32, 0.0 }
  0x30   :  { %v83_v17 = vadd.f32 %v82_v12, %v81_v14  ;;  %v141_v40 = vld [vmem:[#allocation5 + $0x10] sm:$0xf]  ;;  %v170_v41 = vadd.f32 %v169_v36, %v168_v31  ;;  %v173_v43 = vsel %vm74_vm0, %v140_v34, 0.0  ;;  %v56_v44 = vld [vmem:[#allocation2 + $0x34] sm:$0xf]  ;;  %v98_v48 = vsel %vm74_vm0, %v55_v38, 0.0 }
  0x31   :  { %v142_v46 = vld [vmem:[#allocation5 + $0x14] sm:$0xf]  ;;  %v175_v49 = vsel %vm74_vm0, %v141_v40, 0.0  ;;  %v57_v50 = vld [vmem:[#allocation2 + $0x38] sm:$0xf]  ;;  %v100_v54 = vsel %vm74_vm0, %v56_v44, 0.0 }
  0x32   :  { %v85_v20 = vadd.f32 %v84_v15, %v83_v17  ;;  %v172_v47 = vadd.f32 %v171_v37, %v170_v41  ;;  %v143_v52 = vld [vmem:[#allocation5 + $0x18] sm:$0xf]  ;;  %v177_v55 = vsel %vm74_vm0, %v142_v46, 0.0  ;;  %v58_v56 = vld [vmem:[#allocation2 + $0x3c] sm:$0xf]  ;;  %v102_v60 = vsel %vm74_vm0, %v57_v50, 0.0 }
  0x33   :  { %v144_v58 = vld [vmem:[#allocation5 + $0x1c] sm:$0xf]  ;;  %v179_v61 = vsel %vm74_vm0, %v143_v52, 0.0  ;;  %v59_v62 = vld [vmem:[#allocation2 + $0x40] sm:$0xf]  ;;  %v104_v2 = vsel %vm74_vm0, %v58_v56, 0.0 }
  0x34   :  { %v87_v23 = vadd.f32 %v86_v18, %v85_v20  ;;  %v174_v53 = vadd.f32 %v173_v43, %v172_v47  ;;  %v145_v0 = vld [vmem:[#allocation5 + $0x20] sm:$0xf]  ;;  %v181_v3 = vsel %vm74_vm0, %v144_v58, 0.0  ;;  %v60_v4 = vld [vmem:[#allocation2 + $0x44] sm:$0xf]  ;;  %v106_v8 = vsel %vm74_vm0, %v59_v62, 0.0 }
  0x35   :  { %v146_v6 = vld [vmem:[#allocation5 + $0x24] sm:$0xf]  ;;  %v183_v9 = vsel %vm74_vm0, %v145_v0, 0.0  ;;  %v61_v10 = vld [vmem:[#allocation2 + $0x48] sm:$0xf]  ;;  %v108_v14 = vsel %vm74_vm0, %v60_v4, 0.0 }
  0x36   :  { %v89_v27 = vadd.f32 %v88_v21, %v87_v23  ;;  %v176_v59 = vadd.f32 %v175_v49, %v174_v53  ;;  %v147_v12 = vld [vmem:[#allocation5 + $0x28] sm:$0xf]  ;;  %v185_v15 = vsel %vm74_vm0, %v146_v6, 0.0  ;;  %v62_v16 = vld [vmem:[#allocation2 + $0x4c] sm:$0xf]  ;;  %v110_v20 = vsel %vm74_vm0, %v61_v10, 0.0 }
  0x37   :  { %v148_v18 = vld [vmem:[#allocation5 + $0x2c] sm:$0xf]  ;;  %v187_v21 = vsel %vm74_vm0, %v147_v12, 0.0  ;;  %v63_v22 = vld [vmem:[#allocation2 + $0x50] sm:$0xf]  ;;  %v112_v26 = vsel %vm74_vm0, %v62_v16, 0.0 }
  0x38   :  { %v91_v33 = vadd.f32 %v90_v25, %v89_v27  ;;  %v178_v1 = vadd.f32 %v177_v55, %v176_v59  ;;  %v149_v24 = vld [vmem:[#allocation5 + $0x30] sm:$0xf]  ;;  %v189_v27 = vsel %vm74_vm0, %v148_v18, 0.0  ;;  %v64_v28 = vld [vmem:[#allocation2 + $0x54] sm:$0xf]  ;;  %v114_v32 = vsel %vm74_vm0, %v63_v22, 0.0 }
  0x39   :  { %v65_v34 = vld [vmem:[#allocation2 + $0x58] sm:$0xf]  ;;  %v151_v36 = vld [vmem:[#allocation5 + $0x38] sm:$0xf]  ;;  %v116_v38 = vsel %vm74_vm0, %v64_v28, 0.0  ;;  %s310_s11 = scalar_lea.vmem %s237_s10, 64 }
  0x3a   :  { %v93_v39 = vadd.f32 %v92_v30, %v91_v33  ;;  %v180_v7 = vadd.f32 %v179_v61, %v178_v1  ;;  %v150_v30 = vld [vmem:[#allocation5 + $0x34] sm:$0xf]  ;;  %v191_v33 = vsel %vm74_vm0, %v149_v24, 0.0  ;;  %v66_v40 = vld [vmem:[#allocation2 + $0x5c] sm:$0xf]  ;;  %v118_v44 = vsel %vm74_vm0, %v65_v34, 0.0  ;;  %p311_p2 = scmp.ne.s32.totalorder %s237_s10, %s310_s11  ;;  %p316_p4 = scmp.lt.s32.totalorder %s310_s11, %s310_s11 }
  0x3b   :  { %v67_v46 = vld [vmem:[#allocation2 + $0x60] sm:$0xf]  ;;  %v120_v50 = vsel %vm74_vm0, %v66_v40, 0.0  ;;  %v68_v52 = vld [vmem:[#allocation2 + $0x64] sm:$0xf] }
  0x3c   :  { %v95_v45 = vadd.f32 %v94_v35, %v93_v39  ;;  %v182_v13 = vadd.f32 %v181_v3, %v180_v7  ;;  %v193_v39 = vsel %vm74_vm0, %v150_v30, 0.0  ;;  %v122_v56 = vsel %vm74_vm0, %v67_v46, 0.0  ;;  %v69_v58 = vld [vmem:[#allocation2 + $0x68] sm:$0xf]  ;;  %v70_v0 = vld [vmem:[#allocation2 + $0x6c] sm:$0xf]  ;;  %p317_p5 = por %p316_p4, %p315_p3 }
  0x3d   :  { %v124_v62 = vsel %vm74_vm0, %v68_v52, 0.0  ;;  %v126_v4 = vsel %vm74_vm0, %v69_v58, 0.0  ;;  %v71_v6 = vld [vmem:[#allocation2 + $0x70] sm:$0xf]  ;;  %v128_v10 = vsel %vm74_vm0, %v70_v0, 0.0 }
  0x3e   :  { %v97_v51 = vadd.f32 %v96_v42, %v95_v45  ;;  %v184_v19 = vadd.f32 %v183_v9, %v182_v13  ;;  %v152_v42 = vld [vmem:[#allocation5 + $0x3c] sm:$0xf]  ;;  %v195_v45 = vsel %vm74_vm0, %v151_v36, 0.0  ;;  %v72_v12 = vld [vmem:[#allocation2 + $0x74] sm:$0xf]  ;;  %v130_v16 = vsel %vm74_vm0, %v71_v6, 0.0  ;;  %p318_p6 = pnand %p317_p5, %p311_p2 }
  0x3f   :  { %v73_v18 = vld [vmem:[#allocation2 + $0x78] sm:$0xf]  ;;  %v132_v22 = vsel %vm74_vm0, %v72_v12, 0.0  ;;  %v161_v30 = vld [vmem:[#allocation5 + $0x60] sm:$0xf] }
  0x40   :  { %v99_v57 = vadd.f32 %v98_v48, %v97_v51  ;;  %v186_v25 = vadd.f32 %v185_v15, %v184_v19  ;;  %v153_v48 = vld [vmem:[#allocation5 + $0x40] sm:$0xf]  ;;  %v197_v51 = vsel %vm74_vm0, %v152_v42, 0.0  ;;  %v162_v34 = vld [vmem:[#allocation5 + $0x64] sm:$0xf]  ;;  %v215_v36 = vsel %vm74_vm0, %v161_v30, 0.0 }
  0x42   :  { %v101_v63 = vadd.f32 %v100_v54, %v99_v57  ;;  %v188_v31 = vadd.f32 %v187_v21, %v186_v25  ;;  %v154_v54 = vld [vmem:[#allocation5 + $0x44] sm:$0xf]  ;;  %v199_v57 = vsel %vm74_vm0, %v153_v48, 0.0  ;;  %v160_v25 = vld [vmem:[#allocation5 + $0x5c] sm:$0xf] }
  0x44   :  { %v103_v5 = vadd.f32 %v102_v60, %v101_v63  ;;  %v190_v37 = vadd.f32 %v189_v27, %v188_v31  ;;  %v155_v60 = vld [vmem:[#allocation5 + $0x48] sm:$0xf]  ;;  %v201_v63 = vsel %vm74_vm0, %v154_v54, 0.0  ;;  %v134_v27 = vsel %vm74_vm0, %v73_v18, 0.0 }
  0x46   :  { %v105_v11 = vadd.f32 %v104_v2, %v103_v5  ;;  %v192_v43 = vadd.f32 %v191_v33, %v190_v37  ;;  %v156_v2 = vld [vmem:[#allocation5 + $0x4c] sm:$0xf]  ;;  %v203_v5 = vsel %vm74_vm0, %v155_v60, 0.0  ;;  %v163_v37 = vld [vmem:[#allocation5 + $0x68] sm:$0xf] }
  0x48   :  { %v107_v17 = vadd.f32 %v106_v8, %v105_v11  ;;  %v194_v49 = vadd.f32 %v193_v39, %v192_v43  ;;  %v157_v8 = vld [vmem:[#allocation5 + $0x50] sm:$0xf]  ;;  %v205_v11 = vsel %vm74_vm0, %v156_v2, 0.0  ;;  %v217_v39 = vsel %vm74_vm0, %v162_v34, 0.0 }
  0x4a   :  { %v109_v23 = vadd.f32 %v108_v14, %v107_v17  ;;  %v196_v55 = vadd.f32 %v195_v45, %v194_v49  ;;  %v158_v14 = vld [vmem:[#allocation5 + $0x54] sm:$0xf]  ;;  %v207_v17 = vsel %vm74_vm0, %v157_v8, 0.0 }
  0x4c   :  { %v111_v29 = vadd.f32 %v110_v20, %v109_v23  ;;  %v198_v61 = vadd.f32 %v197_v51, %v196_v55  ;;  %v159_v20 = vld [vmem:[#allocation5 + $0x58] sm:$0xf]  ;;  %v209_v23 = vsel %vm74_vm0, %v158_v14, 0.0 }
  0x4d   :  { %v211_v28 = vsel %vm74_vm0, %v159_v20, 0.0 }
  0x4e   :  { %v113_v35 = vadd.f32 %v112_v26, %v111_v29  ;;  %v200_v3 = vadd.f32 %v199_v57, %v198_v61 }
  0x50   :  { %v115_v41 = vadd.f32 %v114_v32, %v113_v35  ;;  %v202_v9 = vadd.f32 %v201_v63, %v200_v3  ;;  %v213_v32 = vsel %vm74_vm0, %v160_v25, 0.0 }
  0x52   :  { %v117_v47 = vadd.f32 %v116_v38, %v115_v41  ;;  %v204_v15 = vadd.f32 %v203_v5, %v202_v9 }
  0x54   :  { %v119_v53 = vadd.f32 %v118_v44, %v117_v47  ;;  %v206_v21 = vadd.f32 %v205_v11, %v204_v15 }
  0x56   :  { %v121_v59 = vadd.f32 %v120_v50, %v119_v53  ;;  %v208_v26 = vadd.f32 %v207_v17, %v206_v21 }
  0x58   :  { %v123_v1 = vadd.f32 %v122_v56, %v121_v59  ;;  %v210_v31 = vadd.f32 %v209_v23, %v208_v26 }
  0x5a   :  { %v125_v7 = vadd.f32 %v124_v62, %v123_v1  ;;  %v212_v35 = vadd.f32 %v211_v28, %v210_v31 }
  0x5c   :  { %v127_v13 = vadd.f32 %v126_v4, %v125_v7  ;;  %v214_v38 = vadd.f32 %v213_v32, %v212_v35 }
  0x5e   :  { %v129_v19 = vadd.f32 %v128_v10, %v127_v13 }
  0x60   :  { %v131_v24 = vadd.f32 %v130_v16, %v129_v19 }
  0x62   :  { %v133_v29 = vadd.f32 %v132_v22, %v131_v24 }
  0x64   :  { %v135_v33 = vadd.f32 %v134_v27, %v133_v29 }
  0x66   :  { %136 = vst [vmem:[#allocation7] sm:$0xf] %v135_v33 }
  0x67   :  { %321 = shalt.err (!%p318_p6)
}
  0x68   :  { %s322_s14 = scalar_lea.hbm %s500_s2, 64 }
  0x69   :  { %p323_p7 = scmp.ne.s32.totalorder %s500_s2, %s322_s14  ;;  %p326_p8 = scmp.lt.u32.totalorder %s322_s14, %s500_s2 }
  0x6b   :  { %p328_p9 = pnand %p326_p8, %p323_p7 }
  0x6d   :  { %331 = shalt.err (!%p328_p9)
}
  0x6e   :  { %239 = dma.vmem_to_hbm [thread:$0]  %s237_s10, 64, %s500_s2, [#allocation4]   ;;  %v164_v40 = vld [vmem:[#allocation5 + $0x6c] sm:$0xf]  ;;  %v216_v41 = vadd.f32 %v215_v36, %v214_v38  ;;  %v219_v42 = vsel %vm74_vm0, %v163_v37, 0.0 }
  0x6f   :  { %v165_v43 = vld [vmem:[#allocation5 + $0x70] sm:$0xf]  ;;  %v221_v45 = vsel %vm74_vm0, %v164_v40, 0.0  ;;  %v166_v46 = vld [vmem:[#allocation5 + $0x74] sm:$0xf]  ;;  %s367_s2 = smov [#allocation8]  }
  0x70   :  { %v218_v44 = vadd.f32 %v217_v39, %v216_v41  ;;  %v223_v48 = vsel %vm74_vm0, %v165_v43, 0.0  ;;  %v167_v49 = vld [vmem:[#allocation5 + $0x78] sm:$0xf]  ;;  %v225_v51 = vsel %vm74_vm0, %v166_v46, 0.0  ;;  %s246_s21 = sshll.u32 %s367_s2, 4  ;;  %s247_s21 = int_to_ptr.vmem [resolvable:$true] %s246_s21 }
  0x71   :  { %v227_v53 = vsel %vm74_vm0, %v167_v49, 0.0  ;;  %s332_s22 = scalar_lea.vmem %s247_s21, 64  ;;  %p337_p11 = scmp.lt.s32.totalorder %s247_s21, %s247_s21 }
  0x72   :  { %v220_v47 = vadd.f32 %v219_v42, %v218_v44  ;;  %p333_p10 = scmp.ne.s32.totalorder %s247_s21, %s332_s22  ;;  %p338_p12 = scmp.lt.s32.totalorder %s332_s22, %s332_s22 }
  0x74   :  { %v222_v50 = vadd.f32 %v221_v45, %v220_v47  ;;  %p339_p13 = por %p338_p12, %p337_p11 }
  0x76   :  { %v224_v52 = vadd.f32 %v223_v48, %v222_v50  ;;  %p340_p0 = pnand %p339_p13, %p333_p10 }
  0x78   :  { %v226_v54 = vadd.f32 %v225_v51, %v224_v52 }
  0x7a   :  { %v228_v55 = vadd.f32 %v227_v53, %v226_v54 }
  0x7c   :  { %229 = vst [vmem:[#allocation8] sm:$0xf] %v228_v55 }
  0x7d   :  { %343 = shalt.err (!%p340_p0)
}
  0x7e   :  { %s344_s25 = scalar_lea.hbm %s501_s3, 64 }
  0x7f   :  { %p345_p1 = scmp.ne.s32.totalorder %s501_s3, %s344_s25  ;;  %p348_p2 = scmp.lt.u32.totalorder %s344_s25, %s501_s3 }
  0x81   :  { %p350_p3 = pnand %p348_p2, %p345_p1 }
  0x83   :  { %353 = shalt.err (!%p350_p3)
}
  0x84   :  { %249 = dma.vmem_to_hbm [thread:$0]  %s247_s21, 64, %s501_s3, [#allocation9]  }
  0x85   :  { %358 = dma.done.wait [#allocation4], 64  }
  0x86   :  { %359 = vsyncadd [#allocation4], 4294967232 }
  0x87   :  { %360 = dma.done.wait [#allocation9], 64  }
  0x88   :  { %361 = vsyncadd [#allocation9], 4294967232 }
  0x89   :  { %256 = vsyncpa [#allocation3], 1 }
  0x8a   :  { %257 = vsyncpa [#allocation6], 1 }
  0x8b   :  { %258 = vsyncpa [#allocation4], 1 }
  0x8c   :  { %259 = vsyncpa [#allocation9], 1 }

</bundles_post_ra>
